<compile_context>
chip_gen: v5e
topology: v5e:2x2
jax: 0.10.0
libtpu: 0.0.40
codegen_flags: <defaults>
</compile_context>

<pallas_src>
import jax
import jax.numpy as jnp
from jax.experimental import pallas as pl
from jax.experimental.pallas import tpu as pltpu


def mlp_kernel(x_ref, w1_ref, b1_ref, w2_ref, b2_ref, w3_ref, b3_ref, o_ref):
    # x / W are bf16 MXU operands; accumulate in f32; bias + ReLU in f32.
    h = jnp.dot(x_ref[...], w1_ref[...], preferred_element_type=jnp.float32)
    h = jnp.maximum(h + b1_ref[...], 0.0)                      # ReLU (f32)

    h = jnp.dot(h.astype(w2_ref.dtype), w2_ref[...],
                preferred_element_type=jnp.float32)
    h = jnp.maximum(h + b2_ref[...], 0.0)                      # ReLU (f32)

    y = jnp.dot(h.astype(w3_ref.dtype), w3_ref[...],
                preferred_element_type=jnp.float32) + b3_ref[...]
    o_ref[...] = y.astype(o_ref.dtype)


def mlp_forward(x, w1, b1, w2, b2, w3, b3, *, tm=128, lane=128,
                compute_dtype=jnp.bfloat16):
    """x: (B, in_features). w_i: (in_dim, out_dim) [already transposed]. b_i: (1, out_dim)."""
    B, in_features = x.shape
    h1 = w1.shape[1]
    h2 = w2.shape[1]
    out_features = w3.shape[1]
    out_dtype = x.dtype

    # Pad batch up to a multiple of the batch tile (handles non-divisible B).
    num_tiles = pl.cdiv(B, tm)
    b_pad = num_tiles * tm
    if b_pad != B:
        x = jnp.pad(x, ((0, b_pad - B), (0, 0)))

    # Lane-dense output: zero-pad the final layer to a multiple of 128 lanes.
    n_out = max(lane, ((out_features + lane - 1) // lane) * lane)
    w3p = jnp.pad(w3, ((0, 0), (0, n_out - out_features)))
    b3p = jnp.pad(b3, ((0, 0), (0, n_out - out_features)))

    # bf16 MXU operands; biases stay f32 (added onto the f32 accumulator).
    xc = x.astype(compute_dtype)
    w1c, w2c, w3c = (w.astype(compute_dtype) for w in (w1, w2, w3p))
    b1c, b2c, b3c = (b.astype(jnp.float32) for b in (b1, b2, b3p))

    const = lambda shape: pl.BlockSpec(shape, lambda i: (0, 0))

    flops = 2 * b_pad * (in_features * h1 + h1 * h2 + h2 * n_out)
    bytes_accessed = int(
        xc.size * xc.dtype.itemsize
        + sum(a.size * a.dtype.itemsize for a in (w1c, b1c, w2c, b2c, w3c, b3c))
        + b_pad * n_out * jnp.dtype(out_dtype).itemsize
    )

    out = pl.pallas_call(
        mlp_kernel,
        out_shape=jax.ShapeDtypeStruct((b_pad, n_out), out_dtype),
        grid_spec=pl.GridSpec(
            grid=(num_tiles,),
            in_specs=[
                pl.BlockSpec((tm, in_features), lambda i: (i, 0)),  # x tile
                const((in_features, h1)),   # w1 (constant across grid)
                const((1, h1)),             # b1
                const((h1, h2)),            # w2
                const((1, h2)),             # b2
                const((h2, n_out)),         # w3 (lane-padded)
                const((1, n_out)),          # b3 (lane-padded)
            ],
            out_specs=pl.BlockSpec((tm, n_out), lambda i: (i, 0)),
        ),
        compiler_params=pltpu.CompilerParams(
            dimension_semantics=("parallel",),        # batch axis -> megacore sharding
            vmem_limit_bytes=48 * 1024 * 1024,        # headroom, safe on v5e/v6e/v7x
        ),
        cost_estimate=pl.CostEstimate(
            flops=flops, transcendentals=0, bytes_accessed=bytes_accessed),
    )(xc, w1c, b1c, w2c, b2c, w3c, b3c)

    # Strip batch padding and the zero-padded output lanes.
    return out[:B, :out_features]


def init_params(key, in_features, h1, h2, out_features=3, dtype=jnp.float32):
    """Deterministic nn.Linear-style init (uniform(-1/sqrt(fan_in), 1/sqrt(fan_in)))."""
    def linear(k, fan_in, fan_out):
        kw, kb = jax.random.split(k)
        bound = 1.0 / jnp.sqrt(fan_in)
        # PyTorch stores W as (out, in); we return it transposed to (in, out).
        w = jax.random.uniform(kw, (fan_in, fan_out), dtype, -bound, bound)
        b = jax.random.uniform(kb, (1, fan_out), dtype, -bound, bound)
        return w, b

    k1, k2, k3 = jax.random.split(key, 3)
    w1, b1 = linear(k1, in_features, h1)
    w2, b2 = linear(k2, h1, h2)
    w3, b3 = linear(k3, h2, out_features)
    return w1, b1, w2, b2, w3, b3


def mlp_reference(x, w1, b1, w2, b2, w3, b3):
    h = jnp.maximum(x @ w1 + b1, 0.0)
    h = jnp.maximum(h @ w2 + b2, 0.0)
    return h @ w3 + b3


if __name__ == "__main__":
    key = jax.random.PRNGKey(0)
    kx, kp = jax.random.split(key)

    batch = 256                      # 2 grid steps of tm=128
    in_features, h1, h2, out_features = 4, 32, 16, 3

    x = jax.random.normal(kx, (batch, in_features), jnp.float32)
    params = init_params(kp, in_features, h1, h2, out_features)

    y = mlp_forward(x, *params, tm=128)
    y = jax.block_until_ready(y)

    # Reference with the same bf16-rounded MXU operands, f32 math.
    rd = lambda a: a.astype(jnp.bfloat16).astype(jnp.float32)
    w1, b1, w2, b2, w3, b3 = params
    y_ref = mlp_reference(rd(x), rd(w1), b1, rd(w2), b2, rd(w3), b3)

    assert y.shape == (batch, out_features)
    assert jnp.allclose(y, y_ref, atol=2e-2, rtol=2e-2), "mismatch vs reference"

    print("KERNEL_OK")
</pallas_src>

<mosaic_0001>
module attributes {stable_mosaic.version = 11 : i64} {
  func.func @mlp_kernel(%arg0: i32, %arg1: memref<128x4xbf16, #tpu.memory_space<vmem>>, %arg2: memref<4x32xbf16, #tpu.memory_space<vmem>>, %arg3: memref<1x32xf32, #tpu.memory_space<vmem>>, %arg4: memref<32x16xbf16, #tpu.memory_space<vmem>>, %arg5: memref<1x16xf32, #tpu.memory_space<vmem>>, %arg6: memref<16x128xbf16, #tpu.memory_space<vmem>>, %arg7: memref<1x128xf32, #tpu.memory_space<vmem>>, %arg8: memref<128x128xf32, #tpu.memory_space<vmem>>) attributes {dimension_semantics = [#tpu.dimension_semantics<parallel>], iteration_bounds = array<i64: 2>, scalar_prefetch = 0 : i64, scratch_operands = 0 : i64, tpu.core_type = #tpu.core_type<tc>, window_params = [{transform_indices = @transform_0, window_bounds = array<i64: 128, 4>}, {pipeline_mode = #tpu.pipeline_mode<synchronous>, transform_indices = @transform_1, window_bounds = array<i64: 4, 32>}, {pipeline_mode = #tpu.pipeline_mode<synchronous>, transform_indices = @transform_2, window_bounds = array<i64: 1, 32>}, {pipeline_mode = #tpu.pipeline_mode<synchronous>, transform_indices = @transform_3, window_bounds = array<i64: 32, 16>}, {pipeline_mode = #tpu.pipeline_mode<synchronous>, transform_indices = @transform_4, window_bounds = array<i64: 1, 16>}, {pipeline_mode = #tpu.pipeline_mode<synchronous>, transform_indices = @transform_5, window_bounds = array<i64: 16, 128>}, {pipeline_mode = #tpu.pipeline_mode<synchronous>, transform_indices = @transform_6, window_bounds = array<i64: 1, 128>}, {transform_indices = @transform_7, window_bounds = array<i64: 128, 128>}]} {
    %c0 = arith.constant 0 : index
    %c0_0 = arith.constant 0 : index
    %0 = vector.load %arg1[%c0, %c0_0] : memref<128x4xbf16, #tpu.memory_space<vmem>>, vector<128x4xbf16>
    %c0_1 = arith.constant 0 : index
    %c0_2 = arith.constant 0 : index
    %1 = vector.load %arg2[%c0_1, %c0_2] : memref<4x32xbf16, #tpu.memory_space<vmem>>, vector<4x32xbf16>
    %cst = arith.constant dense<0.000000e+00> : vector<128x32xf32>
    %2 = tpu.matmul %0, %1, %cst {dimension_numbers = #tpu.dot_dimension_numbers<[1], [0], [0], [1], [0, 0, 1, 1], [], []>} : vector<128x4xbf16>, vector<4x32xbf16>, vector<128x32xf32> -> vector<128x32xf32>
    %c0_3 = arith.constant 0 : index
    %c0_4 = arith.constant 0 : index
    %3 = vector.load %arg3[%c0_3, %c0_4] : memref<1x32xf32, #tpu.memory_space<vmem>>, vector<1x32xf32>
    %4 = vector.broadcast %3 : vector<1x32xf32> to vector<128x32xf32>
    %5 = arith.addf %2, %4 : vector<128x32xf32>
    %cst_5 = arith.constant 0.000000e+00 : f32
    %6 = vector.broadcast %cst_5 : f32 to vector<128x32xf32>
    %7 = arith.maximumf %5, %6 : vector<128x32xf32>
    %8 = arith.truncf %7 : vector<128x32xf32> to vector<128x32xbf16>
    %c0_6 = arith.constant 0 : index
    %c0_7 = arith.constant 0 : index
    %9 = vector.load %arg4[%c0_6, %c0_7] : memref<32x16xbf16, #tpu.memory_space<vmem>>, vector<32x16xbf16>
    %cst_8 = arith.constant dense<0.000000e+00> : vector<128x16xf32>
    %10 = tpu.matmul %8, %9, %cst_8 {dimension_numbers = #tpu.dot_dimension_numbers<[1], [0], [0], [1], [0, 0, 1, 1], [], []>} : vector<128x32xbf16>, vector<32x16xbf16>, vector<128x16xf32> -> vector<128x16xf32>
    %c0_9 = arith.constant 0 : index
    %c0_10 = arith.constant 0 : index
    %11 = vector.load %arg5[%c0_9, %c0_10] : memref<1x16xf32, #tpu.memory_space<vmem>>, vector<1x16xf32>
    %12 = vector.broadcast %11 : vector<1x16xf32> to vector<128x16xf32>
    %13 = arith.addf %10, %12 : vector<128x16xf32>
    %cst_11 = arith.constant 0.000000e+00 : f32
    %14 = vector.broadcast %cst_11 : f32 to vector<128x16xf32>
    %15 = arith.maximumf %13, %14 : vector<128x16xf32>
    %16 = arith.truncf %15 : vector<128x16xf32> to vector<128x16xbf16>
    %c0_12 = arith.constant 0 : index
    %c0_13 = arith.constant 0 : index
    %17 = vector.load %arg6[%c0_12, %c0_13] : memref<16x128xbf16, #tpu.memory_space<vmem>>, vector<16x128xbf16>
    %cst_14 = arith.constant dense<0.000000e+00> : vector<128x128xf32>
    %18 = tpu.matmul %16, %17, %cst_14 {dimension_numbers = #tpu.dot_dimension_numbers<[1], [0], [0], [1], [0, 0, 1, 1], [], []>} : vector<128x16xbf16>, vector<16x128xbf16>, vector<128x128xf32> -> vector<128x128xf32>
    %c0_15 = arith.constant 0 : index
    %c0_16 = arith.constant 0 : index
    %19 = vector.load %arg7[%c0_15, %c0_16] : memref<1x128xf32, #tpu.memory_space<vmem>>, vector<1x128xf32>
    %20 = vector.broadcast %19 : vector<1x128xf32> to vector<128x128xf32>
    %21 = arith.addf %18, %20 : vector<128x128xf32>
    %c0_17 = arith.constant 0 : index
    %c0_18 = arith.constant 0 : index
    %22 = vector.load %arg8[%c0_17, %c0_18] : memref<128x128xf32, #tpu.memory_space<vmem>>, vector<128x128xf32>
    tpu.vector_store %arg8[%c0_17, %c0_18], %21 {strides = array<i32>} : memref<128x128xf32, #tpu.memory_space<vmem>>, vector<128x128xf32>,
    return
  }
  func.func @transform_0(%arg0: i32) -> (i32, i32) {
    %c0_i32 = arith.constant 0 : i32
    %c0_i32_0 = arith.constant 0 : i32
    return %arg0, %c0_i32 : i32, i32
  }
  func.func @transform_1(%arg0: i32) -> (i32, i32) {
    %c0_i32 = arith.constant 0 : i32
    %c0_i32_0 = arith.constant 0 : i32
    %c0_i32_1 = arith.constant 0 : i32
    return %c0_i32, %c0_i32_0 : i32, i32
  }
  func.func @transform_2(%arg0: i32) -> (i32, i32) {
    %c0_i32 = arith.constant 0 : i32
    %c0_i32_0 = arith.constant 0 : i32
    %c0_i32_1 = arith.constant 0 : i32
    return %c0_i32, %c0_i32_0 : i32, i32
  }
  func.func @transform_3(%arg0: i32) -> (i32, i32) {
    %c0_i32 = arith.constant 0 : i32
    %c0_i32_0 = arith.constant 0 : i32
    %c0_i32_1 = arith.constant 0 : i32
    return %c0_i32, %c0_i32_0 : i32, i32
  }
  func.func @transform_4(%arg0: i32) -> (i32, i32) {
    %c0_i32 = arith.constant 0 : i32
    %c0_i32_0 = arith.constant 0 : i32
    %c0_i32_1 = arith.constant 0 : i32
    return %c0_i32, %c0_i32_0 : i32, i32
  }
  func.func @transform_5(%arg0: i32) -> (i32, i32) {
    %c0_i32 = arith.constant 0 : i32
    %c0_i32_0 = arith.constant 0 : i32
    %c0_i32_1 = arith.constant 0 : i32
    return %c0_i32, %c0_i32_0 : i32, i32
  }
  func.func @transform_6(%arg0: i32) -> (i32, i32) {
    %c0_i32 = arith.constant 0 : i32
    %c0_i32_0 = arith.constant 0 : i32
    %c0_i32_1 = arith.constant 0 : i32
    return %c0_i32, %c0_i32_0 : i32, i32
  }
  func.func @transform_7(%arg0: i32) -> (i32, i32) {
    %c0_i32 = arith.constant 0 : i32
    %c0_i32_0 = arith.constant 0 : i32
    return %arg0, %c0_i32 : i32, i32
  }
}

</mosaic_0001>

<bundles_post_ra>
// kernel: tpu_custom_call.1
= control target key start
LH: loop header
LB: loop body
LE: loop exit
PB: predicated region body
PF: predicated region fallthrough
CT: control target
= control target key end

     0   :  { %12 = vsyncpa [#allocation3], 0  ;;  %s1140_s0 = inlined_call_operand.vmem [shape: bf16[256,4], index: 0, kind: input, shape index: {}]   ;;  %s1141_s1 = inlined_call_operand.vmem [shape: bf16[4,32], index: 1, kind: input, shape index: {}]   ;;  %s1142_s2 = inlined_call_operand.vmem [shape: f32[1,32], index: 2, kind: input, shape index: {}]   ;;  %s1143_s3 = inlined_call_operand.vmem [shape: bf16[32,16], index: 3, kind: input, shape index: {}]   ;;  %s1144_s4 = inlined_call_operand.vmem [shape: f32[1,16], index: 4, kind: input, shape index: {}]   ;;  %s1145_s5 = inlined_call_operand.vmem [shape: bf16[16,128], index: 5, kind: input, shape index: {}]   ;;  %s1146_s6 = inlined_call_operand.vmem [shape: f32[1,128], index: 6, kind: input, shape index: {}]   ;;  %s1147_s7 = inlined_call_operand.hbm [shape: f32[256,128], index: 7, kind: output, shape index: {}]  }
   0x1   :  { %14 = vsyncpa [#allocation3 + $0x1], 0  ;;  %s988_s24 = smov 0   ;;  %s990_s25 = smov 0  }
   0x2   :  { %s992_s26 = smov 0   ;;  %s994_s27 = smov 0  }
   0x3 LB: > { %s1009_s28 = sadd.s32 4294967295, %s944_s27   ;;  %s742_s29 = sadd.s32 4294967294, %s944_s27   ;;  %s944_s27 = sphi %s994_s27, %s1153_s27   ;;  %s940_s26 = sphi %s992_s26, %s1152_s26   ;;  %s936_s25 = sphi %s990_s25, %s1151_s25   ;;  %s932_s24 = sphi %s988_s24, %s1150_s24  }
   0x4   : > { %s1013_s30 = sadd.s32 1, %s944_s27   ;;  %s179_s8 = sadd.s32 1, %s940_s26 }
   0x5   : > { %s176_s9 = ssub.s32 %s944_s27, %s1013_s30  ;;  %p189_p0 = scmp.ne.s32.totalorder %s940_s26, %s936_s25 }
   0x6   : > { %p177_p1 = scmp.eq.s32.totalorder %s176_s9, 0  ;;  %p190_p2 = scmp.eq.s32.totalorder %s1009_s28, 1 }
   0x7   : > { %p195_p3 = scmp.ne.s32.totalorder %s936_s25, %s932_s24  ;;  %p196_p4 = scmp.eq.s32.totalorder %s742_s29, 1 }
   0x8   : > { %s1024_s10 = scalar_select %p177_p1, %s940_s26, %s179_s8  }
   0x9   : > { %p1026_p5 = por %p190_p2, %p189_p0  ;;  %p1030_p6 = por %p196_p4, %p195_p3 }
   0xa   : > { %p745_p7 = scmp.ge.s32.totalorder %s944_s27, 1  ;;  %p241_p8 = scmp.lt.s32.totalorder %s944_s27, 3 }
   0xc   : > { %p242_p9 = pnand %p745_p7, %p241_p8 }
   0xd   : > { %s747_s15 = sshll.u32 (!%p242_p9), %s1009_s28, 4  ;;  %s833_s21 = sshll.u32 (!%p242_p9), %s1009_s28, 7 }
   0xe   : > { %245 = sbr.rel (%p242_p9) target bundleno = 568 (0x238), region = 48  ;;  %p274_p10 = scmp.lt.s32.totalorder (!%p242_p9), %s747_s15, 31 }
   0xf   : > { %s676_s29 = scalar_lea.hbm (!%p242_p9), %s1147_s7, %s833_s21  ;;  %s902_s18 = scalar_lea.hbm (!%p242_p9), %s1147_s7, 256 }
  0x10   : > { %s679_s9 = sshll.u32 (!%p242_p9), %s676_s29, 4  ;;  %s680_s9 = int_to_ptr.hbm [resolvable:$true] %s679_s9 }
  0x11   : > { %s896_s14 = sshra.s32 (!%p242_p9), %s680_s9, 4  ;;  %s897_s14 = int_to_ptr.hbm [resolvable:$true] %s896_s14 }
  0x12   : > { %s898_s28 = scalar_lea.hbm (!%p242_p9), %s897_s14, 128  ;;  %p903_p0 = scmp.lt.s32.totalorder (!%p242_p9), %s897_s14, %s1147_s7 }
  0x13   : > { %v297_v0 = vld [vmem:[%s1141_s1] sm:$0x3]  ;;  %vm367_vm0 = vcmask 1041408   ;;  %s1155_s15 = smov (!%p274_p10, %s747_s15), 31  ;;  %vm342_vm1 = vcmask 31744   ;;  %v831_v10 = vld [vmem:[%s1143_s3 + $0x8] sm:$0xff]  ;;  %p899_p11 = scmp.ne.s32.totalorder %s897_s14, %s898_s28 }
  0x14   : > { %v369_v1 = vsel %vm367_vm0, %v297_v0, 0  ;;  %s748_s16 = sshll.u32 %s1155_s15, 2  ;;  %495 = vmatpush.bf16.msra.mxu1 %v831_v10  ;;  %v830_v11 = vld [vmem:[%s1143_s3] sm:$0xff]  ;;  %vm464_vm2 = vcmask 261120   ;;  %vm574_vm3 = vcmask 130048   ;;  %p904_p1 = scmp.lt.s32.totalorder %s902_s18, %s898_s28 }
  0x15   : > { %378 = vmatpush.bf16.msra.mxu0 %v369_v1  ;;  %834 = vmatpush.bf16.msra.mxu3 %v369_v1  ;;  %s277_s19 = scalar_lea.vmem %s1140_s0, %s748_s16  ;;  %v879_v13 = vld [vmem:[%s1142_s2] ss:$0 sm:$0xff]  ;;  %s270_s16 = sand.u32 1, %s936_s25  }
  0x16   : > { %v822_v2 = vld [vmem:[%s277_s19] sm:$0xff]  ;;  %v823_v3 = vld [vmem:[%s277_s19 + $0x8] sm:$0xff]  ;;  %v824_v4 = vld [vmem:[%s277_s19 + $0x10] sm:$0xff]  ;;  %s746_s17 = sshll.u32 %s270_s16, 7  ;;  %s665_s13 = scalar_lea.sflag [#allocation3], %s270_s16 }
  0x17   : > { %v825_v5 = vld [vmem:[%s277_s19 + $0x18] sm:$0xff]  ;;  %v826_v6 = vld [vmem:[%s277_s19 + $0x20] sm:$0xff]  ;;  %v827_v8 = vld [vmem:[%s277_s19 + $0x28] sm:$0xff]  ;;  %s1088_s20 = scalar_lea.vmem [#allocation2], %s746_s17  ;;  %p900_p12 = pnand %p899_p11, %p1026_p5 }
  0x18   : > { %781 = vmatmul.msk.bf16.vlgmr.msra.gmra.mxu0 %vm342_vm1, %v822_v2  ;;  %v829_v7 = vld [vmem:[%s277_s19 + $0x38] sm:$0xff]  ;;  %v828_v9 = vld [vmem:[%s277_s19 + $0x30] sm:$0xff]  ;;  %496 = vmatpush.bf16.msra.mxu1 %v830_v11  ;;  %v832_v2 = vld [vmem:[%s1145_s5] sm:$0xff]  ;;  %s677_s8 = sshll.u32 %s1088_s20, 4  ;;  %p905_p2 = por %p904_p1, %p903_p0  ;;  %s678_s8 = int_to_ptr.vmem [resolvable:$true] %s677_s8 }
  0x19   : > { %788 = vmatmul.msk.bf16.vlgmr.msra.gmra.mxu3 %vm342_vm1, %v829_v7  ;;  %606 = vmatpush.bf16.msra.mxu2 %v832_v2  ;;  %v880_v7 = vld [vmem:[%s1144_s4] ss:$0 sm:$0xff]  ;;  %p901_p13 = pneg %p900_p12 }
  0x1a   : > { %835 = vmatpush.bf16.msrb.mxu3 %v831_v10 }
  0x1b   : > { %p906_p3 = pnand %p905_p2, %p901_p13 }
  0x1e   : > { %836 = vmatpush.bf16.msrb.mxu3 %v830_v11 }
  0x22   : > { %837 = vmatpush.bf16.msra.mxu3 %v832_v2 }
  0x28   : > { %782 = vmatmul.msk.bf16.gmra.mxu0 %vm342_vm1, %v823_v3 }
  0x38   : > { %783 = vmatmul.msk.bf16.gmra.mxu0 %vm342_vm1, %v824_v4 }
  0x48   : > { %784 = vmatmul.msk.bf16.gmra.mxu0 %vm342_vm1, %v825_v5 }
  0x58   : > { %785 = vmatmul.msk.bf16.gmra.mxu0 %vm342_vm1, %v826_v6 }
  0x68   : > { %786 = vmatmul.msk.bf16.gmra.mxu0 %vm342_vm1, %v827_v8 }
  0x78   : > { %787 = vmatmul.msk.bf16.gmra.mxu0 %vm342_vm1, %v828_v9 }
  0x95   : > { %v380_v12 = vpop.f32.mrf.mxu0 }
  0x96   : > { %v381_v14 = vadd.f32 %v879_v13, %v380_v12 }
  0x98   : > { %v420_v17 = vmax.f32 %v381_v14, 0.0 }
  0x9c   : > { %v415_v58 = vpop.f32.mrf.mxu3 }
  0x9d   : > { %v382_v15 = vpop.f32.mrf.mxu0  ;;  %v416_v0 = vadd.f32 %v879_v13, %v415_v58 }
  0x9e   : > { %v383_v16 = vadd.f32 %v879_v13, %v382_v15 }
  0x9f   : > { %v434_v3 = vmax.f32 %v416_v0, 0.0 }
  0xa0   : > { %v421_v18 = vmax.f32 %v383_v16, 0.0 }
  0xa2   : > { %v436_v19 = vpack.c.bf16 %v421_v18, %v420_v17 }
  0xa4   : > { %797 = vmatmul.msk.bf16.vlgmr.msra.gmra.mxu1 %vm464_vm2, %v436_v19  ;;  %v417_v63 = vpop.f32.mrf.mxu3 }
  0xa5   : > { %v385_v20 = vpop.f32.mrf.mxu0  ;;  %v418_v1 = vadd.f32 %v879_v13, %v417_v63  ;;  %v881_v63 = vld [vmem:[%s1146_s6] ss:$0 sm:$0xff] }
  0xa6   : > { %v386_v21 = vadd.f32 %v879_v13, %v385_v20 }
  0xa7   : > { %v435_v4 = vmax.f32 %v418_v1, 0.0 }
  0xa8   : > { %v422_v24 = vmax.f32 %v386_v21, 0.0 }
  0xa9   : > { %v443_v5 = vpack.c.bf16 %v435_v4, %v434_v3 }
  0xad   : > { %v387_v22 = vpop.f32.mrf.mxu0 }
  0xae   : > { %v388_v23 = vadd.f32 %v879_v13, %v387_v22 }
  0xb0   : > { %v423_v25 = vmax.f32 %v388_v23, 0.0 }
  0xb2   : > { %v437_v26 = vpack.c.bf16 %v423_v25, %v422_v24 }
  0xb4   : > { %798 = vmatmul.msk.bf16.gmra.mxu1 %vm464_vm2, %v437_v26 }
  0xb5   : > { %v390_v27 = vpop.f32.mrf.mxu0 }
  0xb6   : > { %v391_v28 = vadd.f32 %v879_v13, %v390_v27 }
  0xb8   : > { %v424_v31 = vmax.f32 %v391_v28, 0.0 }
  0xbd   : > { %v392_v29 = vpop.f32.mrf.mxu0 }
  0xbe   : > { %v393_v30 = vadd.f32 %v879_v13, %v392_v29 }
  0xc0   : > { %v425_v32 = vmax.f32 %v393_v30, 0.0 }
  0xc2   : > { %v438_v33 = vpack.c.bf16 %v425_v32, %v424_v31 }
  0xc4   : > { %799 = vmatmul.msk.bf16.gmra.mxu1 %vm464_vm2, %v438_v33 }
  0xc5   : > { %v395_v34 = vpop.f32.mrf.mxu0 }
  0xc6   : > { %v396_v35 = vadd.f32 %v879_v13, %v395_v34 }
  0xc8   : > { %v426_v38 = vmax.f32 %v396_v35, 0.0 }
  0xcd   : > { %v397_v36 = vpop.f32.mrf.mxu0 }
  0xce   : > { %v398_v37 = vadd.f32 %v879_v13, %v397_v36 }
  0xd0   : > { %v427_v39 = vmax.f32 %v398_v37, 0.0 }
  0xd2   : > { %v439_v40 = vpack.c.bf16 %v427_v39, %v426_v38 }
  0xd4   : > { %800 = vmatmul.msk.bf16.gmra.mxu1 %vm464_vm2, %v439_v40 }
  0xd5   : > { %v400_v41 = vpop.f32.mrf.mxu0 }
  0xd6   : > { %v401_v42 = vadd.f32 %v879_v13, %v400_v41 }
  0xd8   : > { %v428_v45 = vmax.f32 %v401_v42, 0.0 }
  0xdd   : > { %v402_v43 = vpop.f32.mrf.mxu0 }
  0xde   : > { %v403_v44 = vadd.f32 %v879_v13, %v402_v43 }
  0xe0   : > { %v429_v46 = vmax.f32 %v403_v44, 0.0 }
  0xe2   : > { %v440_v47 = vpack.c.bf16 %v429_v46, %v428_v45 }
  0xe4   : > { %801 = vmatmul.msk.bf16.gmra.mxu1 %vm464_vm2, %v440_v47 }
  0xe5   : > { %v405_v48 = vpop.f32.mrf.mxu0 }
  0xe6   : > { %v406_v49 = vadd.f32 %v879_v13, %v405_v48 }
  0xe8   : > { %v430_v52 = vmax.f32 %v406_v49, 0.0 }
  0xed   : > { %v407_v50 = vpop.f32.mrf.mxu0 }
  0xee   : > { %v408_v51 = vadd.f32 %v879_v13, %v407_v50 }
  0xf0   : > { %v431_v53 = vmax.f32 %v408_v51, 0.0 }
  0xf2   : > { %v441_v54 = vpack.c.bf16 %v431_v53, %v430_v52 }
  0xf4   : > { %802 = vmatmul.msk.bf16.gmra.mxu1 %vm464_vm2, %v441_v54 }
  0xf5   : > { %v410_v55 = vpop.f32.mrf.mxu0 }
  0xf6   : > { %v411_v56 = vadd.f32 %v879_v13, %v410_v55 }
  0xf8   : > { %v432_v60 = vmax.f32 %v411_v56, 0.0 }
  0xfd   : > { %v412_v57 = vpop.f32.mrf.mxu0 }
  0xfe   : > { %v413_v59 = vadd.f32 %v879_v13, %v412_v57 }
 0x100   : > { %v433_v61 = vmax.f32 %v413_v59, 0.0 }
 0x102   : > { %v442_v62 = vpack.c.bf16 %v433_v61, %v432_v60 }
 0x104   : > { %803 = vmatmul.msk.bf16.vlgmr.msrb.gmra.mxu3 %vm464_vm2, %v442_v62 }
 0x114   : > { %804 = vmatmul.msk.bf16.gmra.mxu3 %vm464_vm2, %v443_v5 }
 0x121   : > { %v498_v6 = vpop.f32.mrf.mxu1 }
 0x122   : > { %v499_v8 = vadd.f32 %v880_v7, %v498_v6 }
 0x124   : > { %v538_v11 = vmax.f32 %v499_v8, 0.0 }
 0x129   : > { %v500_v9 = vpop.f32.mrf.mxu1 }
 0x12a   : > { %v501_v10 = vadd.f32 %v880_v7, %v500_v9 }
 0x12c   : > { %v539_v12 = vmax.f32 %v501_v10, 0.0 }
 0x12e   : > { %v554_v13 = vpack.c.bf16 %v539_v12, %v538_v11 }
 0x130   : > { %809 = vmatmul.msk.bf16.vlgmr.msra.gmra.mxu2 %vm574_vm3, %v554_v13 }
 0x131   : > { %v503_v14 = vpop.f32.mrf.mxu1 }
 0x132   : > { %v504_v15 = vadd.f32 %v880_v7, %v503_v14 }
 0x134   : > { %v540_v18 = vmax.f32 %v504_v15, 0.0 }
 0x139   : > { %v505_v16 = vpop.f32.mrf.mxu1 }
 0x13a   : > { %v506_v17 = vadd.f32 %v880_v7, %v505_v16 }
 0x13c   : > { %v541_v19 = vmax.f32 %v506_v17, 0.0 }
 0x13e   : > { %v555_v20 = vpack.c.bf16 %v541_v19, %v540_v18 }
 0x140   : > { %810 = vmatmul.msk.bf16.gmra.mxu2 %vm574_vm3, %v555_v20 }
 0x141   : > { %v508_v21 = vpop.f32.mrf.mxu1 }
 0x142   : > { %v509_v22 = vadd.f32 %v880_v7, %v508_v21 }
 0x144   : > { %v542_v25 = vmax.f32 %v509_v22, 0.0 }
 0x149   : > { %v510_v23 = vpop.f32.mrf.mxu1 }
 0x14a   : > { %v511_v24 = vadd.f32 %v880_v7, %v510_v23 }
 0x14c   : > { %v543_v26 = vmax.f32 %v511_v24, 0.0 }
 0x14e   : > { %v556_v27 = vpack.c.bf16 %v543_v26, %v542_v25 }
 0x150   : > { %811 = vmatmul.msk.bf16.gmra.mxu2 %vm574_vm3, %v556_v27 }
 0x151   : > { %v513_v28 = vpop.f32.mrf.mxu1 }
 0x152   : > { %v514_v29 = vadd.f32 %v880_v7, %v513_v28 }
 0x154   : > { %v544_v32 = vmax.f32 %v514_v29, 0.0 }
 0x159   : > { %v515_v30 = vpop.f32.mrf.mxu1 }
 0x15a   : > { %v516_v31 = vadd.f32 %v880_v7, %v515_v30 }
 0x15c   : > { %v545_v33 = vmax.f32 %v516_v31, 0.0 }
 0x15e   : > { %v557_v34 = vpack.c.bf16 %v545_v33, %v544_v32 }
 0x160   : > { %812 = vmatmul.msk.bf16.gmra.mxu2 %vm574_vm3, %v557_v34 }
 0x161   : > { %v518_v35 = vpop.f32.mrf.mxu1 }
 0x162   : > { %v519_v36 = vadd.f32 %v880_v7, %v518_v35 }
 0x164   : > { %v546_v39 = vmax.f32 %v519_v36, 0.0 }
 0x169   : > { %v520_v37 = vpop.f32.mrf.mxu1 }
 0x16a   : > { %v521_v38 = vadd.f32 %v880_v7, %v520_v37 }
 0x16c   : > { %v547_v40 = vmax.f32 %v521_v38, 0.0 }
 0x16e   : > { %v558_v41 = vpack.c.bf16 %v547_v40, %v546_v39 }
 0x170   : > { %813 = vmatmul.msk.bf16.gmra.mxu2 %vm574_vm3, %v558_v41 }
 0x171   : > { %v523_v42 = vpop.f32.mrf.mxu1 }
 0x172   : > { %v524_v43 = vadd.f32 %v880_v7, %v523_v42 }
 0x174   : > { %v548_v46 = vmax.f32 %v524_v43, 0.0 }
 0x179   : > { %v525_v44 = vpop.f32.mrf.mxu1 }
 0x17a   : > { %v526_v45 = vadd.f32 %v880_v7, %v525_v44 }
 0x17c   : > { %v549_v47 = vmax.f32 %v526_v45, 0.0 }
 0x17e   : > { %v559_v48 = vpack.c.bf16 %v549_v47, %v548_v46 }
 0x180   : > { %814 = vmatmul.msk.bf16.gmra.mxu2 %vm574_vm3, %v559_v48 }
 0x187   : > { %v528_v49 = vpop.f32.mrf.mxu3 }
 0x188   : > { %v529_v50 = vadd.f32 %v880_v7, %v528_v49 }
 0x18a   : > { %v550_v53 = vmax.f32 %v529_v50, 0.0 }
 0x18f   : > { %v530_v51 = vpop.f32.mrf.mxu3 }
 0x190   : > { %v531_v52 = vadd.f32 %v880_v7, %v530_v51 }
 0x192   : > { %v551_v54 = vmax.f32 %v531_v52, 0.0 }
 0x194   : > { %v560_v55 = vpack.c.bf16 %v551_v54, %v550_v53 }
 0x196   : > { %815 = vmatmul.msk.bf16.gmra.mxu2 %vm574_vm3, %v560_v55 }
 0x197   : > { %v533_v56 = vpop.f32.mrf.mxu3 }
 0x198   : > { %v534_v57 = vadd.f32 %v880_v7, %v533_v56 }
 0x19a   : > { %v552_v60 = vmax.f32 %v534_v57, 0.0 }
 0x19f   : > { %v535_v58 = vpop.f32.mrf.mxu3 }
 0x1a0   : > { %v536_v59 = vadd.f32 %v880_v7, %v535_v58 }
 0x1a2   : > { %v553_v61 = vmax.f32 %v536_v59, 0.0 }
 0x1a4   : > { %v561_v62 = vpack.c.bf16 %v553_v61, %v552_v60 }
 0x1a6   : > { %816 = vmatmul.msk.bf16.vlgmr.msra.gmra.mxu3 %vm574_vm3, %v561_v62 }
 0x1b3   : > { %v608_v0 = vpop.f32.mrf.mxu2 }
 0x1b4   : > { %v609_v1 = vadd.f32 %v881_v63, %v608_v0 }
 0x1b6   : > { %648 = vst [vmem:[%s1088_s20] sm:$0xff] %v609_v1 }
 0x1bb   : > { %v610_v2 = vpop.f32.mrf.mxu2 }
 0x1bc   : > { %v611_v3 = vadd.f32 %v881_v63, %v610_v2 }
 0x1be   : > { %649 = vst [vmem:[%s1088_s20 + $0x8] sm:$0xff] %v611_v3 }
 0x1c3   : > { %v613_v4 = vpop.f32.mrf.mxu2 }
 0x1c4   : > { %v614_v5 = vadd.f32 %v881_v63, %v613_v4 }
 0x1c6   : > { %650 = vst [vmem:[%s1088_s20 + $0x10] sm:$0xff] %v614_v5 }
 0x1cb   : > { %v615_v6 = vpop.f32.mrf.mxu2 }
 0x1cc   : > { %v616_v7 = vadd.f32 %v881_v63, %v615_v6 }
 0x1ce   : > { %651 = vst [vmem:[%s1088_s20 + $0x18] sm:$0xff] %v616_v7 }
 0x1d3   : > { %v618_v8 = vpop.f32.mrf.mxu2 }
 0x1d4   : > { %v619_v9 = vadd.f32 %v881_v63, %v618_v8 }
 0x1d6   : > { %652 = vst [vmem:[%s1088_s20 + $0x20] sm:$0xff] %v619_v9 }
 0x1db   : > { %v620_v10 = vpop.f32.mrf.mxu2 }
 0x1dc   : > { %v621_v11 = vadd.f32 %v881_v63, %v620_v10 }
 0x1de   : > { %653 = vst [vmem:[%s1088_s20 + $0x28] sm:$0xff] %v621_v11 }
 0x1e3   : > { %v623_v12 = vpop.f32.mrf.mxu2 }
 0x1e4   : > { %v624_v13 = vadd.f32 %v881_v63, %v623_v12 }
 0x1e6   : > { %654 = vst [vmem:[%s1088_s20 + $0x30] sm:$0xff] %v624_v13 }
 0x1eb   : > { %v625_v14 = vpop.f32.mrf.mxu2 }
 0x1ec   : > { %v626_v15 = vadd.f32 %v881_v63, %v625_v14 }
 0x1ee   : > { %655 = vst [vmem:[%s1088_s20 + $0x38] sm:$0xff] %v626_v15 }
 0x1f3   : > { %v628_v16 = vpop.f32.mrf.mxu2 }
 0x1f4   : > { %v629_v17 = vadd.f32 %v881_v63, %v628_v16 }
 0x1f6   : > { %656 = vst [vmem:[%s1088_s20 + $0x40] sm:$0xff] %v629_v17 }
 0x1fb   : > { %v630_v18 = vpop.f32.mrf.mxu2 }
 0x1fc   : > { %v631_v19 = vadd.f32 %v881_v63, %v630_v18 }
 0x1fe   : > { %657 = vst [vmem:[%s1088_s20 + $0x48] sm:$0xff] %v631_v19 }
 0x203   : > { %v633_v20 = vpop.f32.mrf.mxu2 }
 0x204   : > { %v634_v21 = vadd.f32 %v881_v63, %v633_v20 }
 0x206   : > { %658 = vst [vmem:[%s1088_s20 + $0x50] sm:$0xff] %v634_v21 }
 0x20b   : > { %v635_v22 = vpop.f32.mrf.mxu2 }
 0x20c   : > { %v636_v23 = vadd.f32 %v881_v63, %v635_v22 }
 0x20e   : > { %659 = vst [vmem:[%s1088_s20 + $0x58] sm:$0xff] %v636_v23 }
 0x219   : > { %v638_v24 = vpop.f32.mrf.mxu2 }
 0x21a   : > { %v639_v25 = vadd.f32 %v881_v63, %v638_v24 }
 0x21c   : > { %660 = vst [vmem:[%s1088_s20 + $0x60] sm:$0xff] %v639_v25 }
 0x221   : > { %v640_v26 = vpop.f32.mrf.mxu2 }
 0x222   : > { %v641_v27 = vadd.f32 %v881_v63, %v640_v26 }
 0x224   : > { %661 = vst [vmem:[%s1088_s20 + $0x68] sm:$0xff] %v641_v27 }
 0x229   : > { %v643_v28 = vpop.f32.mrf.mxu3 }
 0x22a   : > { %v644_v29 = vadd.f32 %v881_v63, %v643_v28 }
 0x22c   : > { %662 = vst [vmem:[%s1088_s20 + $0x70] sm:$0xff] %v644_v29 }
 0x231   : > { %v645_v30 = vpop.f32.mrf.mxu3 }
 0x232   : > { %v646_v31 = vadd.f32 %v881_v63, %v645_v30 }
 0x234   : > { %663 = vst [vmem:[%s1088_s20 + $0x78] sm:$0xff] %v646_v31 }
 0x235   : > { %909 = shalt.err (!%p906_p3)
}
 0x236   : > { %s946_s16 = smov 128   ;;  %s947_s20 = smov 8  }
 0x237   : > { %838 = dma.vmem_to_hbm [thread:$0]  (%p1026_p5), %s678_s8, 2048, %s680_s9, %s665_s13, %s946_s16, %s946_s16, %s947_s20  }
 0x238 PF: > { %p844_p4 = scmp.ge.s32.totalorder %s944_s27, 2  ;;  %s694_s22 = sand.u32 1, %s932_s24  }
 0x239   : > { %s695_s23 = scalar_lea.sflag [#allocation3], %s694_s22 }
 0x23a   : > { %p841_p7 = pnand %p844_p4, %p1030_p6 }
 0x23c   : > { %p842_p8 = pneg %p841_p7 }
 0x23e   : > { %927 = dma.done.wait (%p842_p8), %s695_s23, 2048  }
 0x23f   : > { %929 = vsyncadd (%p842_p8), %s695_s23, 4294965248  ;;  %p17_p9 = scmp.ge.s32.totalorder %s1013_s30, 4   ;;  %s1150_s24 = smov %s936_s25 }
 0x240   : > { %s1151_s25 = smov %s940_s26  ;;  %s1152_s26 = smov %s1024_s10 }
 0x241   : > { %s1153_s27 = smov %s1013_s30  ;;  %19 = sbr.rel (!%p17_p9) target bundleno = 3 (0x3), region = 83 }
 0x246   :  { %701 = vsyncpa [#allocation3], 1 }
 0x247   :  { %703 = vsyncpa [#allocation3 + $0x1], 1 }

</bundles_post_ra>
